<compile_context>
chip_gen: v7x
topology: tpu7x:2x2x1
jax: 0.10.0
libtpu: 0.0.40
codegen_flags: <defaults>
</compile_context>

<pallas_src>
import functools

import jax
import jax.numpy as jnp
from jax.experimental import pallas as pl
from jax.experimental.pallas import tpu as pltpu

LANES = 128
TARGET_TILE_BYTES = 4 * 1024 * 1024  # per input per pipeline buffer


def _tensorcores_per_device():
    """Best-effort TC-per-device count (2 on v7x-class, else 1)."""
    # TODO(synk): on v7x, confirm with a trace that the leading "parallel"
    # grid axis really shards tiles across both TensorCores; if not, switch
    # the leading axis to pltpu.CORE_PARALLEL / pl.core_map.
    try:
        kind = jax.devices()[0].device_kind.lower()
    except Exception:
        return 1
    return 2 if "v7" in kind else 1


def _sse_kernel(full_rows, tile_rows, tiles_per_part, ragged,
                x_ref, y_ref, out_ref, acc_ref):
    """Accumulate sum of squared differences for one part of the rows."""
    p = pl.program_id(0)  # part (maps to a TensorCore on multi-TC chips)
    i = pl.program_id(1)  # sequential tile index within the part

    @pl.when(i == 0)
    def _():
        acc_ref[...] = jnp.zeros_like(acc_ref)

    d = x_ref[...].astype(jnp.float32) - y_ref[...].astype(jnp.float32)
    sq = d * d

    acc_rows = acc_ref.shape[0]

    def fold(v):
        # Lane-parallel partial sums (VPU adds across `acc_rows` independent
        # chains); the single cross-sublane/lane reduce happens once, in the
        # last-step epilogue.  The reshape only regroups whole (8,128)-aligned
        # row blocks along the major axis, so it does not materialize a copy.
        acc_ref[...] += jnp.sum(v.reshape(-1, acc_rows, LANES), axis=0)

    if ragged:
        # Only the globally-last tile can extend past `full_rows`.  Gate the
        # masking so every steady-state tile stays on the unmasked path.
        start = (p * tiles_per_part + i) * tile_rows
        is_edge = start + tile_rows > full_rows

        @pl.when(is_edge)
        def _():
            row = jax.lax.broadcasted_iota(jnp.int32, sq.shape, 0) + start
            # Use `where` (NOT multiply-by-mask): the OOB-padded region of the
            # auto-DMA'd edge block holds unspecified data, and 0 * NaN = NaN.
            fold(jnp.where(row < full_rows, sq, 0.0))

        @pl.when(jnp.logical_not(is_edge))
        def _():
            fold(sq)
    else:
        fold(sq)

    @pl.when(i == pl.num_programs(1) - 1)
    def _():
        out_ref[...] = jnp.sum(acc_ref[...]).reshape(1, 1, 1)


def perceptual_loss(out_feature, gt_feature):
    """MSE (mean reduction) between two equally-shaped feature tensors."""
    assert out_feature.shape == gt_feature.shape
    n_elements = out_feature.size
    orig_dtype = out_feature.dtype
    itemsize = jnp.dtype(orig_dtype).itemsize

    x = out_feature.reshape(-1)
    y = gt_feature.reshape(-1)

    full_rows = n_elements // LANES
    lane_tail = n_elements - full_rows * LANES

    # < 128 leftover elements: plain-JAX reduce (tiny).
    if lane_tail:
        # NOTE: in this (rare) ragged case the prefix slices below make XLA
        # materialize copies of both inputs; acceptable for small remainders,
        # and a no-op in the common multiple-of-128 case.
        xt = x[full_rows * LANES:].astype(jnp.float32)
        yt = y[full_rows * LANES:].astype(jnp.float32)
        tail_sse = jnp.sum((xt - yt) ** 2)
    else:
        tail_sse = jnp.float32(0.0)

    if full_rows == 0:
        return (tail_sse / n_elements).astype(orig_dtype)

    x2 = x[: full_rows * LANES].reshape(full_rows, LANES)
    y2 = y[: full_rows * LANES].reshape(full_rows, LANES)

    # --- tiling / grid selection -------------------------------------------
    # ~4 MiB of input bytes per block regardless of dtype (8192 rows f32,
    # 16384 rows bf16) -> 2 inputs x 2 pipeline buffers = 16 MiB VMEM.
    target_rows = max(32, TARGET_TILE_BYTES // (LANES * itemsize))
    if full_rows >= target_rows:
        tile_rows = target_rows
    else:
        tile_rows = full_rows  # single full-extent block (always legal)

    n_tiles = pl.cdiv(full_rows, tile_rows)
    ragged = (full_rows % tile_rows) != 0

    # 2-way part split only on multi-TC (v7x-class) devices, only when the
    # tile count splits evenly (no clamped/redundant duplicate tile, no
    # unconditional masking).  Single-TC v5e/v6e always use one part.
    num_parts = 1
    if _tensorcores_per_device() >= 2 and n_tiles >= 4 and n_tiles % 2 == 0:
        num_parts = 2
    tiles_per_part = n_tiles // num_parts

    # Wider accumulator (4 vregs) when the tile allows -> ILP across VALU slots.
    if tile_rows % 32 == 0:
        acc_rows = 32
    elif tile_rows % 8 == 0:
        acc_rows = 8
    else:
        acc_rows = tile_rows

    def in_index_map(p, i):
        return (p * tiles_per_part + i, 0)

    kernel = functools.partial(_sse_kernel, full_rows, tile_rows,
                               tiles_per_part, ragged)

    kernel_elems = full_rows * LANES
    cost = pl.CostEstimate(
        flops=3 * kernel_elems,                       # sub, mul, add
        transcendentals=0,
        bytes_accessed=2 * kernel_elems * itemsize + 4 * num_parts,
    )

    partial_sse = pl.pallas_call(
        kernel,
        out_shape=jax.ShapeDtypeStruct((num_parts, 1, 1), jnp.float32),
        grid_spec=pltpu.PrefetchScalarGridSpec(
            num_scalar_prefetch=0,
            grid=(num_parts, tiles_per_part),
            in_specs=[
                pl.BlockSpec((tile_rows, LANES), in_index_map),
                pl.BlockSpec((tile_rows, LANES), in_index_map),
            ],
            out_specs=pl.BlockSpec((1, 1, 1), lambda p, i: (p, 0, 0)),
            scratch_shapes=[pltpu.VMEM((acc_rows, LANES), jnp.float32)],
        ),
        compiler_params=pltpu.CompilerParams(
            dimension_semantics=("parallel", "arbitrary"),
            vmem_limit_bytes=32 * 1024 * 1024,
        ),
        cost_estimate=cost,
    )(x2, y2)

    total_sse = jnp.sum(partial_sse) + tail_sse
    # PyTorch's MSELoss returns a scalar in the input dtype.
    return (total_sse / n_elements).astype(orig_dtype)


if __name__ == "__main__":
    key = jax.random.PRNGKey(0)
    k1, k2 = jax.random.split(key)
    # Small feature maps consistent with a perceptual-loss use case: NCHW.
    out_feature = jax.random.normal(k1, (2, 4, 16, 16), dtype=jnp.float32)
    gt_feature = jax.random.normal(k2, (2, 4, 16, 16), dtype=jnp.float32)

    loss = perceptual_loss(out_feature, gt_feature)
    jax.block_until_ready(loss)

    # Sanity check against plain-JAX MSE.
    ref = jnp.mean((out_feature - gt_feature) ** 2)
    assert jnp.allclose(loss, ref, rtol=1e-5, atol=1e-6), (loss, ref)

    print("KERNEL_OK")
</pallas_src>

<mosaic_0001>
module attributes {stable_mosaic.version = 11 : i64} {
  func.func @_sse_kernel(%arg0: i32, %arg1: i32, %arg2: memref<16x128xf32, #tpu.memory_space<vmem>>, %arg3: memref<16x128xf32, #tpu.memory_space<vmem>>, %arg4: memref<1x1x1xf32, #tpu.memory_space<vmem>>, %arg5: memref<8x128xf32, #tpu.memory_space<vmem>>) attributes {dimension_semantics = [#tpu.dimension_semantics<parallel>, #tpu.dimension_semantics<arbitrary>], iteration_bounds = array<i64: 1, 1>, scalar_prefetch = 0 : i64, scratch_operands = 1 : i64, tpu.core_type = #tpu.core_type<tc>, window_params = [{transform_indices = @transform_0, window_bounds = array<i64: 16, 128>}, {transform_indices = @transform_1, window_bounds = array<i64: 16, 128>}, {transform_indices = @transform_2, window_bounds = array<i64: 1, 1, 1>}]} {
    %c0_i32 = arith.constant 0 : i32
    %0 = arith.cmpi eq, %arg1, %c0_i32 : i32
    %1 = arith.extui %0 : i1 to i32
    %c0_i32_0 = arith.constant 0 : i32
    %2 = arith.cmpi ne, %1, %c0_i32_0 : i32
    scf.if %2 {
      %cst_10 = arith.constant 0.000000e+00 : f32
      %15 = vector.broadcast %cst_10 : f32 to vector<8x128xf32>
      %c0_11 = arith.constant 0 : index
      %c0_12 = arith.constant 0 : index
      %16 = vector.load %arg5[%c0_11, %c0_12] : memref<8x128xf32, #tpu.memory_space<vmem>>, vector<8x128xf32>
      tpu.vector_store %arg5[%c0_11, %c0_12], %15 {strides = array<i32>} : memref<8x128xf32, #tpu.memory_space<vmem>>, vector<8x128xf32>,
    } else {
    }
    %c0 = arith.constant 0 : index
    %c0_1 = arith.constant 0 : index
    %3 = vector.load %arg2[%c0, %c0_1] : memref<16x128xf32, #tpu.memory_space<vmem>>, vector<16x128xf32>
    %c0_2 = arith.constant 0 : index
    %c0_3 = arith.constant 0 : index
    %4 = vector.load %arg3[%c0_2, %c0_3] : memref<16x128xf32, #tpu.memory_space<vmem>>, vector<16x128xf32>
    %5 = arith.subf %3, %4 : vector<16x128xf32>
    %6 = arith.mulf %5, %5 : vector<16x128xf32>
    %c0_4 = arith.constant 0 : index
    %c0_5 = arith.constant 0 : index
    %7 = vector.load %arg5[%c0_4, %c0_5] : memref<8x128xf32, #tpu.memory_space<vmem>>, vector<8x128xf32>
    %8 = vector.shape_cast %6 : vector<16x128xf32> to vector<2x8x128xf32>
    %cst = arith.constant dense<0.000000e+00> : vector<8x128xf32>
    %9 = vector.multi_reduction <add>, %8, %cst [0] : vector<2x8x128xf32> to vector<8x128xf32>
    %10 = arith.addf %7, %9 : vector<8x128xf32>
    %c0_6 = arith.constant 0 : index
    %c0_7 = arith.constant 0 : index
    %11 = vector.load %arg5[%c0_6, %c0_7] : memref<8x128xf32, #tpu.memory_space<vmem>>, vector<8x128xf32>
    tpu.vector_store %arg5[%c0_6, %c0_7], %10 {strides = array<i32>} : memref<8x128xf32, #tpu.memory_space<vmem>>, vector<8x128xf32>,
    %c0_i32_8 = arith.constant 0 : i32
    %12 = arith.cmpi eq, %arg1, %c0_i32_8 : i32
    %13 = arith.extui %12 : i1 to i32
    %c0_i32_9 = arith.constant 0 : i32
    %14 = arith.cmpi ne, %13, %c0_i32_9 : i32
    scf.if %14 {
      %c0_10 = arith.constant 0 : index
      %c0_11 = arith.constant 0 : index
      %15 = vector.load %arg5[%c0_10, %c0_11] : memref<8x128xf32, #tpu.memory_space<vmem>>, vector<8x128xf32>
      %16 = vector.shape_cast %15 : vector<8x128xf32> to vector<1x8x128xf32>
      %cst_12 = arith.constant dense<0.000000e+00> : vector<1xf32>
      %17 = vector.multi_reduction <add>, %16, %cst_12 [1, 2] : vector<1x8x128xf32> to vector<1xf32>
      %18 = vector.shape_cast %17 : vector<1xf32> to vector<1x1x1xf32>
      %19 = vector.extract %18[0, 0, 0] : f32 from vector<1x1x1xf32>
      %20 = vector.broadcast %19 : f32 to vector<1x1x1xf32>
      %c0_13 = arith.constant 0 : index
      %c0_14 = arith.constant 0 : index
      %c0_15 = arith.constant 0 : index
      %21 = vector.load %arg4[%c0_13, %c0_14, %c0_15] : memref<1x1x1xf32, #tpu.memory_space<vmem>>, vector<1x1x1xf32>
      tpu.vector_store %arg4[%c0_13, %c0_14, %c0_15], %20 {strides = array<i32>} : memref<1x1x1xf32, #tpu.memory_space<vmem>>, vector<1x1x1xf32>,
    } else {
    }
    return
  }
  func.func @transform_0(%arg0: i32, %arg1: i32) -> (i32, i32) {
    %c1_i32 = arith.constant 1 : i32
    %0 = arith.muli %arg0, %c1_i32 : i32
    %1 = arith.addi %0, %arg1 : i32
    %c0_i32 = arith.constant 0 : i32
    %c0_i32_0 = arith.constant 0 : i32
    return %1, %c0_i32 : i32, i32
  }
  func.func @transform_1(%arg0: i32, %arg1: i32) -> (i32, i32) {
    %c1_i32 = arith.constant 1 : i32
    %0 = arith.muli %arg0, %c1_i32 : i32
    %1 = arith.addi %0, %arg1 : i32
    %c0_i32 = arith.constant 0 : i32
    %c0_i32_0 = arith.constant 0 : i32
    return %1, %c0_i32 : i32, i32
  }
  func.func @transform_2(%arg0: i32, %arg1: i32) -> (i32, i32, i32) {
    %c0_i32 = arith.constant 0 : i32
    %c0_i32_0 = arith.constant 0 : i32
    %c0_i32_1 = arith.constant 0 : i32
    return %arg0, %c0_i32, %c0_i32_0 : i32, i32, i32
  }
}

</mosaic_0001>

<bundles_post_ra>
// kernel: tpu_custom_call.1
= control target key start
LH: loop header
LB: loop body
LE: loop exit
PB: predicated region body
PF: predicated region fallthrough
CT: control target
= control target key end

     0   :  { %7 = vsyncpa [#allocation4], 0  ;;  %s236_s0 = inlined_call_operand.hbm [shape: f32[16,128], index: 0, kind: input, shape index: {}]   ;;  %s237_s1 = inlined_call_operand.hbm [shape: f32[16,128], index: 1, kind: input, shape index: {}]   ;;  %s238_s2 = inlined_call_operand.hbm [shape: f32[1,1,1], index: 2, kind: output, shape index: {}]  }
   0x1   :  { %8 = vsyncpa [#allocation7], 0 }
   0x2   :  { %9 = vsyncpa [#allocation5], 0  ;;  %s180_s9 = smov [#allocation3]   ;;  %s108_s13 = scalar_lea.hbm %s236_s0, 256 }
   0x3   :  { %s19_s10 = sshll.u32 %s180_s9, 4  ;;  %p109_p0 = scmp.ne.s32.totalorder %s236_s0, %s108_s13  ;;  %s20_s10 = int_to_ptr.vmem [resolvable:$true] %s19_s10 }
   0x4   :  { %p112_p1 = scmp.lt.u32.totalorder %s108_s13, %s236_s0 }
   0x6   :  { %p114_p2 = pnand %p112_p1, %p109_p0 }
   0x8   :  { %117 = shalt.err (!%p114_p2)
}
   0x9   :  { %s118_s18 = scalar_lea.vmem %s20_s10, 256  ;;  %p123_p4 = scmp.lt.s32.totalorder %s20_s10, %s20_s10 }
   0xa   :  { %p119_p3 = scmp.ne.s32.totalorder %s20_s10, %s118_s18  ;;  %p124_p5 = scmp.lt.s32.totalorder %s118_s18, %s118_s18 }
   0xc   :  { %p125_p6 = por %p124_p5, %p123_p4 }
   0xe   :  { %p126_p7 = pnand %p125_p6, %p119_p3 }
  0x10   :  { %129 = shalt.err (!%p126_p7)
}
  0x11   :  { %s181_s19 = smov 128   ;;  %s182_s20 = smov 8  }
  0x12   :  { %25 = dma.hbm_to_vmem [thread:$0]  %s236_s0, 256, %s20_s10, [#allocation4], %s181_s19, %s181_s19, %s182_s20  }
  0x13   :  { %s183_s23 = smov [#allocation6]   ;;  %s130_s27 = scalar_lea.hbm %s237_s1, 256 }
  0x14   :  { %s35_s24 = sshll.u32 %s183_s23, 4  ;;  %p131_p8 = scmp.ne.s32.totalorder %s237_s1, %s130_s27  ;;  %s36_s24 = int_to_ptr.vmem [resolvable:$true] %s35_s24 }
  0x15   :  { %p134_p9 = scmp.lt.u32.totalorder %s130_s27, %s237_s1 }
  0x17   :  { %p136_p10 = pnand %p134_p9, %p131_p8 }
  0x19   :  { %139 = shalt.err (!%p136_p10)
}
  0x1a   :  { %s140_s4 = scalar_lea.vmem %s36_s24, 256  ;;  %p145_p12 = scmp.lt.s32.totalorder %s36_s24, %s36_s24 }
  0x1b   :  { %p141_p11 = scmp.ne.s32.totalorder %s36_s24, %s140_s4  ;;  %p146_p13 = scmp.lt.s32.totalorder %s140_s4, %s140_s4 }
  0x1d   :  { %p147_p0 = por %p146_p13, %p145_p12 }
  0x1f   :  { %p148_p1 = pnand %p147_p0, %p141_p11 }
  0x21   :  { %151 = shalt.err (!%p148_p1)
}
  0x22   :  { %41 = dma.hbm_to_vmem [thread:$0]  %s237_s1, 256, %s36_s24, [#allocation7], %s181_s19, %s181_s19, %s182_s20  }
  0x23   :  { %174 = dma.done.wait [#allocation4], 256  }
  0x24   :  { %175 = vsyncadd [#allocation4], 4294967040 }
  0x25   :  { %176 = dma.done.wait [#allocation7], 256  }
  0x26   :  { %177 = vsyncadd [#allocation7], 4294967040  ;;  %v57_v0 = vld [vmem:[#allocation3] sm:$0xff]  ;;  %v58_v1 = vld [vmem:[#allocation3 + $0x8] sm:$0xff]  ;;  %s184_s1 = smov [#allocation8]   ;;  %vm83_vm0 = vcmask 0  }
  0x27   :  { %v59_v2 = vld [vmem:[#allocation6] sm:$0xff]  ;;  %v60_v3 = vld [vmem:[#allocation6 + $0x8] sm:$0xff]  ;;  %s91_s6 = sshll.u32 %s184_s1, 4  ;;  %s92_s6 = int_to_ptr.vmem [resolvable:$true] %s91_s6 }
  0x28   :  { %v61_v4 = vsub.f32 %v57_v0, %v59_v2  ;;  %v62_v5 = vsub.f32 %v58_v1, %v60_v3  ;;  %s152_s8 = scalar_lea.vmem %s92_s6, 16  ;;  %s156_s9 = scalar_lea.vmem %s92_s6, 32 }
  0x29   :  { %p153_p2 = scmp.ne.s32.totalorder %s92_s6, %s152_s8  ;;  %p157_p3 = scmp.lt.s32.totalorder %s92_s6, %s92_s6 }
  0x2a   :  { %v63_v6 = vmul.f32 %v61_v4, %v61_v4  ;;  %v64_v7 = vmul.f32 %v62_v5, %v62_v5  ;;  %p158_p4 = scmp.lt.s32.totalorder %s156_s9, %s152_s8 }
  0x2c   :  { %v66_v8 = vadd.f32 %v64_v7, %v63_v6  ;;  %p159_p5 = por %p158_p4, %p157_p3 }
  0x2e   :  { %73 = vadd.xlane.f32.xlu0 %v66_v8  ;;  %p160_p6 = pnand %p159_p5, %p153_p2 }
  0xbb   :  { %v74_v9 = vpop.xlane.xlu0 %73 }
  0xbc   :  { %v75_v10 = vrot.slane %v74_v9, 4 }
  0xbe   :  { %v76_v11 = vadd.f32 %v75_v10, %v74_v9 }
  0xc0   :  { %v77_v12 = vrot.slane %v76_v11, 2 }
  0xc2   :  { %v78_v13 = vadd.f32 %v77_v12, %v76_v11 }
  0xc4   :  { %v79_v14 = vrot.slane %v78_v13, 1 }
  0xc6   :  { %v80_v15 = vadd.f32 %v79_v14, %v78_v13 }
  0xc8   :  { %101 = vpush %v80_v15 }
  0xf9   :  { %s102_s7 = spop %101 }
  0xfa   :  { %v82_v16 = vstv %s102_s7 }
  0xfb   :  { %84 = vst.msk [vmem:[#allocation8] sm:$0x1] %vm83_vm0, %v82_v16 }
  0xfc   :  { %163 = shalt.err (!%p160_p6)
}
  0xfd   :  { %s164_s12 = scalar_lea.hbm %s238_s2, 16 }
  0xfe   :  { %p165_p7 = scmp.ne.s32.totalorder %s238_s2, %s164_s12  ;;  %p168_p8 = scmp.lt.u32.totalorder %s164_s12, %s238_s2 }
 0x100   :  { %p170_p9 = pnand %p168_p8, %p165_p7 }
 0x102   :  { %173 = shalt.err (!%p170_p9)
}
 0x103   :  { %94 = dma.vmem_to_hbm [thread:$0]  %s92_s6, 16, %s238_s2, [#allocation5]  }
 0x104   :  { %178 = dma.done.wait [#allocation5], 16  }
 0x105   :  { %179 = vsyncadd [#allocation5], 4294967280 }
 0x106   :  { %98 = vsyncpa [#allocation4], 1 }
 0x107   :  { %99 = vsyncpa [#allocation7], 1 }
 0x108   :  { %100 = vsyncpa [#allocation5], 1 }

</bundles_post_ra>
